<compile_context>
chip_gen: v5e
topology: v5e:2x2
jax: 0.10.0
libtpu: 0.0.40
codegen_flags: <defaults>
</compile_context>

<pallas_src>
import functools

import jax
import jax.numpy as jnp
from jax.experimental import pallas as pl
from jax.experimental.pallas import tpu as pltpu

LAMBDA_CLASS = 1.0
LAMBDA_NOOBJ = 10.0
LAMBDA_OBJ = 1.0
LAMBDA_BOX = 10.0


def yolo_loss_kernel(inv_anch_ref, pred_ref, tgt_ref, out_ref, *,
                     m_rows, tile_r, tiles_per_chunk, num_classes):
    """Grid = (A, P, T); T is the reduction axis.

    inv_anch_ref : (A, 2) f32 in SMEM (scalar prefetch; 1/anchor_w, 1/anchor_h)
    pred_ref     : (5 + C, TILE_R, 128) bf16   channel-major, rows as (sublane, lane)
    tgt_ref      : (6, TILE_R, 128)     f32    [obj, x, y, w, h, class]
    out_ref      : (6, TILE_R? no -> 8, 128)   f32 resident accumulator
      rows: 0 sum bce*noobj, 1 sum bce*obj, 2 sum sse_box*obj,
            3 sum ce*obj,    4 n_obj,       5 n_noobj
    """
    a = pl.program_id(0)
    p = pl.program_id(1)
    t = pl.program_id(2)

    @pl.when(t == 0)
    def _init():
        out_ref[...] = jnp.zeros_like(out_ref)

    # Validity mask for the zero-padded tail of the flattened N*S*S row axis.
    blk0 = (p * tiles_per_chunk + t) * tile_r
    sub = jax.lax.broadcasted_iota(jnp.int32, (tile_r, 128), 0)
    lane = jax.lax.broadcasted_iota(jnp.int32, (tile_r, 128), 1)
    row_id = (blk0 + sub) * 128 + lane
    valid = row_id < m_rows

    tobj = tgt_ref[0].astype(jnp.float32)                       # (TILE_R, 128)
    obj = jnp.logical_and(tobj == 1.0, valid)
    noobj = jnp.logical_and(tobj == 0.0, valid)

    inv_aw = inv_anch_ref[a, 0]
    inv_ah = inv_anch_ref[a, 1]

    # ---- BCE-with-logits on the objectness channel (shared by obj / noobj) ----
    x0 = pred_ref[0].astype(jnp.float32)
    bce = jnp.maximum(x0, 0.0) - x0 * tobj + jnp.log1p(jnp.exp(-jnp.abs(x0)))

    # ---- Box loss: squared diffs over channels 1:5 on obj cells ----
    dx = jax.nn.sigmoid(pred_ref[1].astype(jnp.float32)) - tgt_ref[1].astype(jnp.float32)
    dy = jax.nn.sigmoid(pred_ref[2].astype(jnp.float32)) - tgt_ref[2].astype(jnp.float32)
    # Guard the log so noobj / padded rows can never produce NaN.
    # TODO(synk): obj cells with target w/h == 0 hit log(1e-16) ~ -36.8, exactly
    #   like the PyTorch reference (numerical landmine inherited from it).
    ratio_w = jnp.where(obj, tgt_ref[3].astype(jnp.float32) * inv_aw, 1.0)
    ratio_h = jnp.where(obj, tgt_ref[4].astype(jnp.float32) * inv_ah, 1.0)
    dw = pred_ref[3].astype(jnp.float32) - jnp.log(1e-16 + ratio_w)
    dh = pred_ref[4].astype(jnp.float32) - jnp.log(1e-16 + ratio_h)
    sse = dx * dx + dy * dy + dw * dw + dh * dh

    # ---- Cross-entropy over class logits of obj cells ----
    # Per-channel slices only (no whole-block f32 temp); C is small so the second
    # pass over the class channels is a cheap VMEM re-load.
    label = tgt_ref[5].astype(jnp.float32)
    mx = pred_ref[5].astype(jnp.float32)
    for c in range(1, num_classes):
        mx = jnp.maximum(mx, pred_ref[5 + c].astype(jnp.float32))
    sum_exp = jnp.zeros((tile_r, 128), jnp.float32)
    picked = jnp.zeros((tile_r, 128), jnp.float32)
    for c in range(num_classes):
        lc = pred_ref[5 + c].astype(jnp.float32)
        sum_exp = sum_exp + jnp.exp(lc - mx)
        picked = picked + jnp.where(label == float(c), lc, 0.0)
    ce = mx + jnp.log(sum_exp) - picked

    # ---- Fold each partial sublane-wise to one dense (8, 128) vreg and
    #      accumulate into the resident output block (unmasked stores only). ----
    def fold(q):                                   # (TILE_R, 128) -> (8, 128)
        acc = q[0:8, :]
        for i in range(1, tile_r // 8):
            acc = acc + q[i * 8:(i + 1) * 8, :]
        return acc

    out_ref[0] += fold(jnp.where(noobj, bce, 0.0))
    out_ref[1] += fold(jnp.where(obj, bce, 0.0))
    out_ref[2] += fold(jnp.where(obj, sse, 0.0))
    out_ref[3] += fold(jnp.where(obj, ce, 0.0))
    out_ref[4] += fold(obj.astype(jnp.float32))
    out_ref[5] += fold(noobj.astype(jnp.float32))


def _cdiv(a, b):
    return -(-a // b)


def _round_up(x, m):
    return _cdiv(x, m) * m


@functools.partial(jax.jit, static_argnames=("tile_r_max", "num_row_chunks"))
def yolo_loss(predictions, target, anchors, *, tile_r_max=256, num_row_chunks=2):
    """predictions: (N, A, S, S, 5+C), target: (N, A, S, S, 6), anchors: (A, 2)."""
    N, A, S, _, DP = predictions.shape
    C = DP - 5
    m_rows = N * S * S

    # Channel-major layout; bf16 cast BEFORE the transpose (pred only; targets
    # stay f32 so obj masks, class labels and box values are exact).
    # TODO(synk): if the detection head can emit channel-major activations this
    #   transpose pass disappears entirely.
    pred_cm = jnp.transpose(predictions.astype(jnp.bfloat16),
                            (1, 4, 0, 2, 3)).reshape(A, DP, m_rows)
    tgt_cm = jnp.transpose(target.astype(jnp.float32),
                           (1, 4, 0, 2, 3)).reshape(A, 6, m_rows)

    # Row-block the flattened row axis as (R, 128) and choose the tiling:
    # P parallel row-chunks x T reduction tiles x TILE_R sublane-blocks per tile.
    r_rows = _cdiv(m_rows, 128)
    p_chunks = num_row_chunks if r_rows >= 8 * num_row_chunks else 1
    chunk = _cdiv(r_rows, p_chunks)
    n_tiles = _cdiv(chunk, tile_r_max)
    tile_r = _round_up(_cdiv(chunk, n_tiles), 8)
    r_pad = p_chunks * n_tiles * tile_r
    m_pad = r_pad * 128

    pad = m_pad - m_rows
    if pad:
        # Plain zero-pad; padded rows are masked in-kernel against m_rows.
        pred_cm = jnp.pad(pred_cm, ((0, 0), (0, 0), (0, pad)))
        tgt_cm = jnp.pad(tgt_cm, ((0, 0), (0, 0), (0, pad)))
    pred_cm = pred_cm.reshape(A, DP, r_pad, 128)
    tgt_cm = tgt_cm.reshape(A, 6, r_pad, 128)

    # Reciprocal anchors via scalar prefetch (SMEM): no per-step divides.
    inv_anch = 1.0 / anchors.astype(jnp.float32)

    kernel = functools.partial(
        yolo_loss_kernel, m_rows=m_rows, tile_r=tile_r,
        tiles_per_chunk=n_tiles, num_classes=C)

    grid_spec = pltpu.PrefetchScalarGridSpec(
        num_scalar_prefetch=1,
        grid=(A, p_chunks, n_tiles),
        in_specs=[
            pl.BlockSpec((None, DP, tile_r, 128),
                         lambda a, p, t, inv: (a, 0, p * n_tiles + t, 0)),
            pl.BlockSpec((None, 6, tile_r, 128),
                         lambda a, p, t, inv: (a, 0, p * n_tiles + t, 0)),
        ],
        out_specs=pl.BlockSpec((None, 6, 8, 128),
                               lambda a, p, t, inv: (a * p_chunks + p, 0, 0, 0)),
    )

    partials = pl.pallas_call(
        kernel,
        out_shape=jax.ShapeDtypeStruct((A * p_chunks, 6, 8, 128), jnp.float32),
        grid_spec=grid_spec,
        compiler_params=pltpu.CompilerParams(
            # anchors x row-chunks parallel -> balanced across v7x's 2 TCs;
            # harmless on single-TC v5e/v6e.
            dimension_semantics=("parallel", "parallel", "arbitrary"),
            vmem_limit_bytes=32 * 1024 * 1024,
        ),
    )(inv_anch, pred_cm, tgt_cm)

    # Tiny finalize in the wrapper: reduce the small vector partials and combine.
    sums = jnp.sum(partials, axis=(0, 2, 3))       # (6,)
    # TODO(synk): n_obj / n_noobj are clamped to 1 so an all-obj or all-noobj
    #   batch yields 0 for the empty term instead of the reference's NaN.
    n_obj = jnp.maximum(sums[4], 1.0)
    n_noobj = jnp.maximum(sums[5], 1.0)
    no_object_loss = sums[0] / n_noobj
    object_loss = sums[1] / n_obj
    box_loss = sums[2] / (4.0 * n_obj)
    class_loss = sums[3] / n_obj
    return (LAMBDA_BOX * box_loss
            + LAMBDA_OBJ * object_loss
            + LAMBDA_NOOBJ * no_object_loss
            + LAMBDA_CLASS * class_loss)


def ref_yolo_loss(predictions, target, anchors):
    """Pure-JAX (eager, boolean-mask) reference matching the (fixed) PyTorch math."""
    obj = target[..., 0] == 1
    noobj = target[..., 0] == 0

    def bce(x, y):
        return jnp.mean(jnp.maximum(x, 0.0) - x * y + jnp.log1p(jnp.exp(-jnp.abs(x))))

    no_object_loss = bce(predictions[..., 0:1][noobj], target[..., 0:1][noobj])
    object_loss = bce(predictions[..., 0:1][obj], target[..., 0:1][obj])

    anchors_r = anchors.reshape(1, 3, 1, 1, 2)
    pred_box = jnp.concatenate(
        [jax.nn.sigmoid(predictions[..., 1:3]), predictions[..., 3:5]], axis=-1)
    tgt_box = jnp.concatenate(
        [target[..., 1:3], jnp.log(1e-16 + target[..., 3:5] / anchors_r)], axis=-1)
    box_loss = jnp.mean((pred_box[obj] - tgt_box[obj]) ** 2)

    logits = predictions[..., 5:][obj]
    labels = target[..., 5][obj].astype(jnp.int32)
    logz = jax.nn.logsumexp(logits, axis=-1)
    picked = jnp.take_along_axis(logits, labels[:, None], axis=-1)[:, 0]
    class_loss = jnp.mean(logz - picked)

    return (LAMBDA_BOX * box_loss + LAMBDA_OBJ * object_loss
            + LAMBDA_NOOBJ * no_object_loss + LAMBDA_CLASS * class_loss)


if __name__ == "__main__":
    key = jax.random.PRNGKey(0)
    N, A, S, C = 2, 3, 16, 4
    k1, k2, k3, k4, k5 = jax.random.split(key, 5)

    predictions = jax.random.normal(k1, (N, A, S, S, 5 + C), dtype=jnp.float32)
    obj_chan = (jax.random.uniform(k2, (N, A, S, S, 1)) < 0.15).astype(jnp.float32)
    xy = jax.random.uniform(k3, (N, A, S, S, 2), minval=0.05, maxval=0.95)
    wh = jax.random.uniform(k4, (N, A, S, S, 2), minval=0.05, maxval=1.5)
    cls = jax.random.randint(k5, (N, A, S, S, 1), 0, C).astype(jnp.float32)
    target = jnp.concatenate([obj_chan, xy, wh, cls], axis=-1)
    # guarantee at least one obj and one noobj cell
    target = target.at[0, 0, 0, 0, 0].set(1.0)
    target = target.at[-1, -1, -1, -1, 0].set(0.0)

    anchors = jnp.array([[0.28, 0.22], [0.38, 0.48], [0.90, 0.78]], dtype=jnp.float32)

    loss = jax.block_until_ready(yolo_loss(predictions, target, anchors))
    ref = ref_yolo_loss(predictions, target, anchors)

    assert bool(jnp.isfinite(loss)), f"non-finite loss {loss}"
    rel = abs(float(loss) - float(ref)) / max(1.0, abs(float(ref)))
    assert rel < 1e-2, (float(loss), float(ref))
    print("KERNEL_OK")
</pallas_src>

<mosaic_0001>
module attributes {stable_mosaic.version = 11 : i64} {
  func.func @yolo_loss_kernel(%arg0: i32, %arg1: i32, %arg2: i32, %arg3: memref<3x2xf32, #tpu.memory_space<smem>>, %arg4: memref<1x9x8x128xbf16, #tpu.memory_space<vmem>>, %arg5: memref<1x6x8x128xf32, #tpu.memory_space<vmem>>, %arg6: memref<1x6x8x128xf32, #tpu.memory_space<vmem>>) attributes {dimension_semantics = [#tpu.dimension_semantics<parallel>, #tpu.dimension_semantics<parallel>, #tpu.dimension_semantics<arbitrary>], iteration_bounds = array<i64: 3, 1, 1>, scalar_prefetch = 1 : i64, scratch_operands = 0 : i64, tpu.core_type = #tpu.core_type<tc>, window_params = [{transform_indices = @transform_0, window_bounds = array<i64: 1, 9, 8, 128>}, {transform_indices = @transform_1, window_bounds = array<i64: 1, 6, 8, 128>}, {transform_indices = @transform_2, window_bounds = array<i64: 1, 6, 8, 128>}]} {
    %c0_i32 = arith.constant 0 : i32
    %0 = arith.cmpi eq, %arg2, %c0_i32 : i32
    %1 = arith.extui %0 : i1 to i32
    %c0_i32_0 = arith.constant 0 : i32
    %2 = arith.cmpi ne, %1, %c0_i32_0 : i32
    scf.if %2 {
      %cst_141 = arith.constant 0.000000e+00 : f32
      %209 = vector.broadcast %cst_141 : f32 to vector<6x8x128xf32>
      %c0_142 = arith.constant 0 : index
      %c0_143 = arith.constant 0 : index
      %c0_144 = arith.constant 0 : index
      %c0_145 = arith.constant 0 : index
      %210 = vector.load %arg6[%c0_142, %c0_143, %c0_144, %c0_145] : memref<1x6x8x128xf32, #tpu.memory_space<vmem>>, vector<1x6x8x128xf32>
      %211 = vector.shape_cast %210 : vector<1x6x8x128xf32> to vector<6x8x128xf32>
      %212 = vector.shape_cast %209 : vector<6x8x128xf32> to vector<1x6x8x128xf32>
      tpu.vector_store %arg6[%c0_142, %c0_143, %c0_144, %c0_145], %212 {strides = array<i32>} : memref<1x6x8x128xf32, #tpu.memory_space<vmem>>, vector<1x6x8x128xf32>,
    } else {
    }
    %c1_i32 = arith.constant 1 : i32
    %3 = arith.muli %arg1, %c1_i32 : i32
    %4 = arith.addi %3, %arg2 : i32
    %c8_i32 = arith.constant 8 : i32
    %5 = arith.muli %4, %c8_i32 : i32
    %6 = tpu.iota {dimensions = array<i32: 0>} : vector<8x128xi32>
    %7 = tpu.iota {dimensions = array<i32: 1>} : vector<8x128xi32>
    %8 = vector.broadcast %5 : i32 to vector<8x128xi32>
    %9 = arith.addi %8, %6 : vector<8x128xi32>
    %c128_i32 = arith.constant 128 : i32
    %10 = vector.broadcast %c128_i32 : i32 to vector<8x128xi32>
    %11 = arith.muli %9, %10 : vector<8x128xi32>
    %12 = arith.addi %11, %7 : vector<8x128xi32>
    %c512_i32 = arith.constant 512 : i32
    %13 = vector.broadcast %c512_i32 : i32 to vector<8x128xi32>
    %14 = arith.cmpi slt, %12, %13 : vector<8x128xi32>
    %c0 = arith.constant 0 : index
    %c0_1 = arith.constant 0 : index
    %c0_2 = arith.constant 0 : index
    %c0_3 = arith.constant 0 : index
    %15 = vector.load %arg5[%c0, %c0_1, %c0_2, %c0_3] : memref<1x6x8x128xf32, #tpu.memory_space<vmem>>, vector<1x1x8x128xf32>
    %16 = vector.shape_cast %15 : vector<1x1x8x128xf32> to vector<8x128xf32>
    %cst = arith.constant 1.000000e+00 : f32
    %17 = vector.broadcast %cst : f32 to vector<8x128xf32>
    %18 = arith.cmpf oeq, %16, %17 : vector<8x128xf32>
    %19 = arith.andi %18, %14 : vector<8x128xi1>
    %cst_4 = arith.constant 0.000000e+00 : f32
    %20 = vector.broadcast %cst_4 : f32 to vector<8x128xf32>
    %21 = arith.cmpf oeq, %16, %20 : vector<8x128xf32>
    %22 = arith.andi %21, %14 : vector<8x128xi1>
    %23 = arith.index_cast %arg0 : i32 to index
    %c0_5 = arith.constant 0 : index
    %24 = memref.load %arg3[%23, %c0_5] : memref<3x2xf32, #tpu.memory_space<smem>>
    %25 = arith.index_cast %arg0 : i32 to index
    %c1 = arith.constant 1 : index
    %26 = memref.load %arg3[%25, %c1] : memref<3x2xf32, #tpu.memory_space<smem>>
    %c0_6 = arith.constant 0 : index
    %c0_7 = arith.constant 0 : index
    %c0_8 = arith.constant 0 : index
    %c0_9 = arith.constant 0 : index
    %27 = vector.load %arg4[%c0_6, %c0_7, %c0_8, %c0_9] : memref<1x9x8x128xbf16, #tpu.memory_space<vmem>>, vector<1x1x8x128xbf16>
    %28 = vector.shape_cast %27 : vector<1x1x8x128xbf16> to vector<8x128xbf16>
    %29 = arith.extf %28 : vector<8x128xbf16> to vector<8x128xf32>
    %cst_10 = arith.constant 0.000000e+00 : f32
    %30 = vector.broadcast %cst_10 : f32 to vector<8x128xf32>
    %31 = arith.maximumf %29, %30 : vector<8x128xf32>
    %32 = arith.mulf %29, %16 : vector<8x128xf32>
    %33 = arith.subf %31, %32 : vector<8x128xf32>
    %34 = math.absf %29 : vector<8x128xf32>
    %cst_11 = arith.constant 0.000000e+00 : f32
    %35 = vector.broadcast %cst_11 : f32 to vector<8x128xf32>
    %36 = arith.subf %35, %34 : vector<8x128xf32>
    %37 = math.exp %36 : vector<8x128xf32>
    %38 = math.log1p %37 : vector<8x128xf32>
    %39 = arith.addf %33, %38 : vector<8x128xf32>
    %c0_12 = arith.constant 0 : index
    %c1_13 = arith.constant 1 : index
    %c0_14 = arith.constant 0 : index
    %c0_15 = arith.constant 0 : index
    %40 = vector.load %arg4[%c0_12, %c1_13, %c0_14, %c0_15] : memref<1x9x8x128xbf16, #tpu.memory_space<vmem>>, vector<1x1x8x128xbf16>
    %41 = vector.shape_cast %40 : vector<1x1x8x128xbf16> to vector<8x128xbf16>
    %42 = arith.extf %41 : vector<8x128xbf16> to vector<8x128xf32>
    %43 = arith.negf %42 : vector<8x128xf32>
    %44 = math.exp %43 : vector<8x128xf32>
    %cst_16 = arith.constant 1.000000e+00 : f32
    %45 = vector.broadcast %cst_16 : f32 to vector<8x128xf32>
    %46 = arith.addf %45, %44 : vector<8x128xf32>
    %47 = arith.divf %45, %46 : vector<8x128xf32>
    %c0_17 = arith.constant 0 : index
    %c1_18 = arith.constant 1 : index
    %c0_19 = arith.constant 0 : index
    %c0_20 = arith.constant 0 : index
    %48 = vector.load %arg5[%c0_17, %c1_18, %c0_19, %c0_20] : memref<1x6x8x128xf32, #tpu.memory_space<vmem>>, vector<1x1x8x128xf32>
    %49 = vector.shape_cast %48 : vector<1x1x8x128xf32> to vector<8x128xf32>
    %50 = arith.subf %47, %49 : vector<8x128xf32>
    %c0_21 = arith.constant 0 : index
    %c2 = arith.constant 2 : index
    %c0_22 = arith.constant 0 : index
    %c0_23 = arith.constant 0 : index
    %51 = vector.load %arg4[%c0_21, %c2, %c0_22, %c0_23] : memref<1x9x8x128xbf16, #tpu.memory_space<vmem>>, vector<1x1x8x128xbf16>
    %52 = vector.shape_cast %51 : vector<1x1x8x128xbf16> to vector<8x128xbf16>
    %53 = arith.extf %52 : vector<8x128xbf16> to vector<8x128xf32>
    %54 = arith.negf %53 : vector<8x128xf32>
    %55 = math.exp %54 : vector<8x128xf32>
    %cst_24 = arith.constant 1.000000e+00 : f32
    %56 = vector.broadcast %cst_24 : f32 to vector<8x128xf32>
    %57 = arith.addf %56, %55 : vector<8x128xf32>
    %58 = arith.divf %56, %57 : vector<8x128xf32>
    %c0_25 = arith.constant 0 : index
    %c2_26 = arith.constant 2 : index
    %c0_27 = arith.constant 0 : index
    %c0_28 = arith.constant 0 : index
    %59 = vector.load %arg5[%c0_25, %c2_26, %c0_27, %c0_28] : memref<1x6x8x128xf32, #tpu.memory_space<vmem>>, vector<1x1x8x128xf32>
    %60 = vector.shape_cast %59 : vector<1x1x8x128xf32> to vector<8x128xf32>
    %61 = arith.subf %58, %60 : vector<8x128xf32>
    %c0_29 = arith.constant 0 : index
    %c3 = arith.constant 3 : index
    %c0_30 = arith.constant 0 : index
    %c0_31 = arith.constant 0 : index
    %62 = vector.load %arg5[%c0_29, %c3, %c0_30, %c0_31] : memref<1x6x8x128xf32, #tpu.memory_space<vmem>>, vector<1x1x8x128xf32>
    %63 = vector.shape_cast %62 : vector<1x1x8x128xf32> to vector<8x128xf32>
    %64 = vector.broadcast %24 : f32 to vector<8x128xf32>
    %65 = arith.mulf %63, %64 : vector<8x128xf32>
    %cst_32 = arith.constant 1.000000e+00 : f32
    %66 = vector.broadcast %cst_32 : f32 to vector<8x128xf32>
    %67 = arith.select %19, %65, %66 : vector<8x128xi1>, vector<8x128xf32>
    %c0_33 = arith.constant 0 : index
    %c4 = arith.constant 4 : index
    %c0_34 = arith.constant 0 : index
    %c0_35 = arith.constant 0 : index
    %68 = vector.load %arg5[%c0_33, %c4, %c0_34, %c0_35] : memref<1x6x8x128xf32, #tpu.memory_space<vmem>>, vector<1x1x8x128xf32>
    %69 = vector.shape_cast %68 : vector<1x1x8x128xf32> to vector<8x128xf32>
    %70 = vector.broadcast %26 : f32 to vector<8x128xf32>
    %71 = arith.mulf %69, %70 : vector<8x128xf32>
    %cst_36 = arith.constant 1.000000e+00 : f32
    %72 = vector.broadcast %cst_36 : f32 to vector<8x128xf32>
    %73 = arith.select %19, %71, %72 : vector<8x128xi1>, vector<8x128xf32>
    %c0_37 = arith.constant 0 : index
    %c3_38 = arith.constant 3 : index
    %c0_39 = arith.constant 0 : index
    %c0_40 = arith.constant 0 : index
    %74 = vector.load %arg4[%c0_37, %c3_38, %c0_39, %c0_40] : memref<1x9x8x128xbf16, #tpu.memory_space<vmem>>, vector<1x1x8x128xbf16>
    %75 = vector.shape_cast %74 : vector<1x1x8x128xbf16> to vector<8x128xbf16>
    %76 = arith.extf %75 : vector<8x128xbf16> to vector<8x128xf32>
    %cst_41 = arith.constant 1.000000e-16 : f32
    %77 = vector.broadcast %cst_41 : f32 to vector<8x128xf32>
    %78 = arith.addf %77, %67 : vector<8x128xf32>
    %79 = math.log %78 : vector<8x128xf32>
    %80 = arith.subf %76, %79 : vector<8x128xf32>
    %c0_42 = arith.constant 0 : index
    %c4_43 = arith.constant 4 : index
    %c0_44 = arith.constant 0 : index
    %c0_45 = arith.constant 0 : index
    %81 = vector.load %arg4[%c0_42, %c4_43, %c0_44, %c0_45] : memref<1x9x8x128xbf16, #tpu.memory_space<vmem>>, vector<1x1x8x128xbf16>
    %82 = vector.shape_cast %81 : vector<1x1x8x128xbf16> to vector<8x128xbf16>
    %83 = arith.extf %82 : vector<8x128xbf16> to vector<8x128xf32>
    %cst_46 = arith.constant 1.000000e-16 : f32
    %84 = vector.broadcast %cst_46 : f32 to vector<8x128xf32>
    %85 = arith.addf %84, %73 : vector<8x128xf32>
    %86 = math.log %85 : vector<8x128xf32>
    %87 = arith.subf %83, %86 : vector<8x128xf32>
    %88 = arith.mulf %50, %50 : vector<8x128xf32>
    %89 = arith.mulf %61, %61 : vector<8x128xf32>
    %90 = arith.addf %88, %89 : vector<8x128xf32>
    %91 = arith.mulf %80, %80 : vector<8x128xf32>
    %92 = arith.addf %90, %91 : vector<8x128xf32>
    %93 = arith.mulf %87, %87 : vector<8x128xf32>
    %94 = arith.addf %92, %93 : vector<8x128xf32>
    %c0_47 = arith.constant 0 : index
    %c5 = arith.constant 5 : index
    %c0_48 = arith.constant 0 : index
    %c0_49 = arith.constant 0 : index
    %95 = vector.load %arg5[%c0_47, %c5, %c0_48, %c0_49] : memref<1x6x8x128xf32, #tpu.memory_space<vmem>>, vector<1x1x8x128xf32>
    %96 = vector.shape_cast %95 : vector<1x1x8x128xf32> to vector<8x128xf32>
    %c0_50 = arith.constant 0 : index
    %c5_51 = arith.constant 5 : index
    %c0_52 = arith.constant 0 : index
    %c0_53 = arith.constant 0 : index
    %97 = vector.load %arg4[%c0_50, %c5_51, %c0_52, %c0_53] : memref<1x9x8x128xbf16, #tpu.memory_space<vmem>>, vector<1x1x8x128xbf16>
    %98 = vector.shape_cast %97 : vector<1x1x8x128xbf16> to vector<8x128xbf16>
    %99 = arith.extf %98 : vector<8x128xbf16> to vector<8x128xf32>
    %c0_54 = arith.constant 0 : index
    %c6 = arith.constant 6 : index
    %c0_55 = arith.constant 0 : index
    %c0_56 = arith.constant 0 : index
    %100 = vector.load %arg4[%c0_54, %c6, %c0_55, %c0_56] : memref<1x9x8x128xbf16, #tpu.memory_space<vmem>>, vector<1x1x8x128xbf16>
    %101 = vector.shape_cast %100 : vector<1x1x8x128xbf16> to vector<8x128xbf16>
    %102 = arith.extf %101 : vector<8x128xbf16> to vector<8x128xf32>
    %103 = arith.maximumf %99, %102 : vector<8x128xf32>
    %c0_57 = arith.constant 0 : index
    %c7 = arith.constant 7 : index
    %c0_58 = arith.constant 0 : index
    %c0_59 = arith.constant 0 : index
    %104 = vector.load %arg4[%c0_57, %c7, %c0_58, %c0_59] : memref<1x9x8x128xbf16, #tpu.memory_space<vmem>>, vector<1x1x8x128xbf16>
    %105 = vector.shape_cast %104 : vector<1x1x8x128xbf16> to vector<8x128xbf16>
    %106 = arith.extf %105 : vector<8x128xbf16> to vector<8x128xf32>
    %107 = arith.maximumf %103, %106 : vector<8x128xf32>
    %c0_60 = arith.constant 0 : index
    %c8 = arith.constant 8 : index
    %c0_61 = arith.constant 0 : index
    %c0_62 = arith.constant 0 : index
    %108 = vector.load %arg4[%c0_60, %c8, %c0_61, %c0_62] : memref<1x9x8x128xbf16, #tpu.memory_space<vmem>>, vector<1x1x8x128xbf16>
    %109 = vector.shape_cast %108 : vector<1x1x8x128xbf16> to vector<8x128xbf16>
    %110 = arith.extf %109 : vector<8x128xbf16> to vector<8x128xf32>
    %111 = arith.maximumf %107, %110 : vector<8x128xf32>
    %cst_63 = arith.constant 0.000000e+00 : f32
    %112 = vector.broadcast %cst_63 : f32 to vector<8x128xf32>
    %cst_64 = arith.constant 0.000000e+00 : f32
    %113 = vector.broadcast %cst_64 : f32 to vector<8x128xf32>
    %c0_65 = arith.constant 0 : index
    %c5_66 = arith.constant 5 : index
    %c0_67 = arith.constant 0 : index
    %c0_68 = arith.constant 0 : index
    %114 = vector.load %arg4[%c0_65, %c5_66, %c0_67, %c0_68] : memref<1x9x8x128xbf16, #tpu.memory_space<vmem>>, vector<1x1x8x128xbf16>
    %115 = vector.shape_cast %114 : vector<1x1x8x128xbf16> to vector<8x128xbf16>
    %116 = arith.extf %115 : vector<8x128xbf16> to vector<8x128xf32>
    %117 = arith.subf %116, %111 : vector<8x128xf32>
    %118 = math.exp %117 : vector<8x128xf32>
    %119 = arith.addf %112, %118 : vector<8x128xf32>
    %cst_69 = arith.constant 0.000000e+00 : f32
    %120 = vector.broadcast %cst_69 : f32 to vector<8x128xf32>
    %121 = arith.cmpf oeq, %96, %120 : vector<8x128xf32>
    %cst_70 = arith.constant 0.000000e+00 : f32
    %122 = vector.broadcast %cst_70 : f32 to vector<8x128xf32>
    %123 = arith.select %121, %116, %122 : vector<8x128xi1>, vector<8x128xf32>
    %124 = arith.addf %113, %123 : vector<8x128xf32>
    %c0_71 = arith.constant 0 : index
    %c6_72 = arith.constant 6 : index
    %c0_73 = arith.constant 0 : index
    %c0_74 = arith.constant 0 : index
    %125 = vector.load %arg4[%c0_71, %c6_72, %c0_73, %c0_74] : memref<1x9x8x128xbf16, #tpu.memory_space<vmem>>, vector<1x1x8x128xbf16>
    %126 = vector.shape_cast %125 : vector<1x1x8x128xbf16> to vector<8x128xbf16>
    %127 = arith.extf %126 : vector<8x128xbf16> to vector<8x128xf32>
    %128 = arith.subf %127, %111 : vector<8x128xf32>
    %129 = math.exp %128 : vector<8x128xf32>
    %130 = arith.addf %119, %129 : vector<8x128xf32>
    %cst_75 = arith.constant 1.000000e+00 : f32
    %131 = vector.broadcast %cst_75 : f32 to vector<8x128xf32>
    %132 = arith.cmpf oeq, %96, %131 : vector<8x128xf32>
    %cst_76 = arith.constant 0.000000e+00 : f32
    %133 = vector.broadcast %cst_76 : f32 to vector<8x128xf32>
    %134 = arith.select %132, %127, %133 : vector<8x128xi1>, vector<8x128xf32>
    %135 = arith.addf %124, %134 : vector<8x128xf32>
    %c0_77 = arith.constant 0 : index
    %c7_78 = arith.constant 7 : index
    %c0_79 = arith.constant 0 : index
    %c0_80 = arith.constant 0 : index
    %136 = vector.load %arg4[%c0_77, %c7_78, %c0_79, %c0_80] : memref<1x9x8x128xbf16, #tpu.memory_space<vmem>>, vector<1x1x8x128xbf16>
    %137 = vector.shape_cast %136 : vector<1x1x8x128xbf16> to vector<8x128xbf16>
    %138 = arith.extf %137 : vector<8x128xbf16> to vector<8x128xf32>
    %139 = arith.subf %138, %111 : vector<8x128xf32>
    %140 = math.exp %139 : vector<8x128xf32>
    %141 = arith.addf %130, %140 : vector<8x128xf32>
    %cst_81 = arith.constant 2.000000e+00 : f32
    %142 = vector.broadcast %cst_81 : f32 to vector<8x128xf32>
    %143 = arith.cmpf oeq, %96, %142 : vector<8x128xf32>
    %cst_82 = arith.constant 0.000000e+00 : f32
    %144 = vector.broadcast %cst_82 : f32 to vector<8x128xf32>
    %145 = arith.select %143, %138, %144 : vector<8x128xi1>, vector<8x128xf32>
    %146 = arith.addf %135, %145 : vector<8x128xf32>
    %c0_83 = arith.constant 0 : index
    %c8_84 = arith.constant 8 : index
    %c0_85 = arith.constant 0 : index
    %c0_86 = arith.constant 0 : index
    %147 = vector.load %arg4[%c0_83, %c8_84, %c0_85, %c0_86] : memref<1x9x8x128xbf16, #tpu.memory_space<vmem>>, vector<1x1x8x128xbf16>
    %148 = vector.shape_cast %147 : vector<1x1x8x128xbf16> to vector<8x128xbf16>
    %149 = arith.extf %148 : vector<8x128xbf16> to vector<8x128xf32>
    %150 = arith.subf %149, %111 : vector<8x128xf32>
    %151 = math.exp %150 : vector<8x128xf32>
    %152 = arith.addf %141, %151 : vector<8x128xf32>
    %cst_87 = arith.constant 3.000000e+00 : f32
    %153 = vector.broadcast %cst_87 : f32 to vector<8x128xf32>
    %154 = arith.cmpf oeq, %96, %153 : vector<8x128xf32>
    %cst_88 = arith.constant 0.000000e+00 : f32
    %155 = vector.broadcast %cst_88 : f32 to vector<8x128xf32>
    %156 = arith.select %154, %149, %155 : vector<8x128xi1>, vector<8x128xf32>
    %157 = arith.addf %146, %156 : vector<8x128xf32>
    %158 = math.log %152 : vector<8x128xf32>
    %159 = arith.addf %111, %158 : vector<8x128xf32>
    %160 = arith.subf %159, %157 : vector<8x128xf32>
    %c0_89 = arith.constant 0 : index
    %c0_90 = arith.constant 0 : index
    %c0_91 = arith.constant 0 : index
    %c0_92 = arith.constant 0 : index
    %161 = vector.load %arg6[%c0_89, %c0_90, %c0_91, %c0_92] : memref<1x6x8x128xf32, #tpu.memory_space<vmem>>, vector<1x1x8x128xf32>
    %162 = vector.shape_cast %161 : vector<1x1x8x128xf32> to vector<8x128xf32>
    %cst_93 = arith.constant 0.000000e+00 : f32
    %163 = vector.broadcast %cst_93 : f32 to vector<8x128xf32>
    %164 = arith.select %22, %39, %163 : vector<8x128xi1>, vector<8x128xf32>
    %165 = arith.addf %162, %164 : vector<8x128xf32>
    %c0_94 = arith.constant 0 : index
    %c0_95 = arith.constant 0 : index
    %c0_96 = arith.constant 0 : index
    %c0_97 = arith.constant 0 : index
    %166 = vector.load %arg6[%c0_94, %c0_95, %c0_96, %c0_97] : memref<1x6x8x128xf32, #tpu.memory_space<vmem>>, vector<1x1x8x128xf32>
    %167 = vector.shape_cast %166 : vector<1x1x8x128xf32> to vector<8x128xf32>
    %168 = vector.shape_cast %165 : vector<8x128xf32> to vector<1x1x8x128xf32>
    tpu.vector_store %arg6[%c0_94, %c0_95, %c0_96, %c0_97], %168 {strides = array<i32>} : memref<1x6x8x128xf32, #tpu.memory_space<vmem>>, vector<1x1x8x128xf32>,
    %c0_98 = arith.constant 0 : index
    %c1_99 = arith.constant 1 : index
    %c0_100 = arith.constant 0 : index
    %c0_101 = arith.constant 0 : index
    %169 = vector.load %arg6[%c0_98, %c1_99, %c0_100, %c0_101] : memref<1x6x8x128xf32, #tpu.memory_space<vmem>>, vector<1x1x8x128xf32>
    %170 = vector.shape_cast %169 : vector<1x1x8x128xf32> to vector<8x128xf32>
    %cst_102 = arith.constant 0.000000e+00 : f32
    %171 = vector.broadcast %cst_102 : f32 to vector<8x128xf32>
    %172 = arith.select %19, %39, %171 : vector<8x128xi1>, vector<8x128xf32>
    %173 = arith.addf %170, %172 : vector<8x128xf32>
    %c0_103 = arith.constant 0 : index
    %c1_104 = arith.constant 1 : index
    %c0_105 = arith.constant 0 : index
    %c0_106 = arith.constant 0 : index
    %174 = vector.load %arg6[%c0_103, %c1_104, %c0_105, %c0_106] : memref<1x6x8x128xf32, #tpu.memory_space<vmem>>, vector<1x1x8x128xf32>
    %175 = vector.shape_cast %174 : vector<1x1x8x128xf32> to vector<8x128xf32>
    %176 = vector.shape_cast %173 : vector<8x128xf32> to vector<1x1x8x128xf32>
    tpu.vector_store %arg6[%c0_103, %c1_104, %c0_105, %c0_106], %176 {strides = array<i32>} : memref<1x6x8x128xf32, #tpu.memory_space<vmem>>, vector<1x1x8x128xf32>,
    %c0_107 = arith.constant 0 : index
    %c2_108 = arith.constant 2 : index
    %c0_109 = arith.constant 0 : index
    %c0_110 = arith.constant 0 : index
    %177 = vector.load %arg6[%c0_107, %c2_108, %c0_109, %c0_110] : memref<1x6x8x128xf32, #tpu.memory_space<vmem>>, vector<1x1x8x128xf32>
    %178 = vector.shape_cast %177 : vector<1x1x8x128xf32> to vector<8x128xf32>
    %cst_111 = arith.constant 0.000000e+00 : f32
    %179 = vector.broadcast %cst_111 : f32 to vector<8x128xf32>
    %180 = arith.select %19, %94, %179 : vector<8x128xi1>, vector<8x128xf32>
    %181 = arith.addf %178, %180 : vector<8x128xf32>
    %c0_112 = arith.constant 0 : index
    %c2_113 = arith.constant 2 : index
    %c0_114 = arith.constant 0 : index
    %c0_115 = arith.constant 0 : index
    %182 = vector.load %arg6[%c0_112, %c2_113, %c0_114, %c0_115] : memref<1x6x8x128xf32, #tpu.memory_space<vmem>>, vector<1x1x8x128xf32>
    %183 = vector.shape_cast %182 : vector<1x1x8x128xf32> to vector<8x128xf32>
    %184 = vector.shape_cast %181 : vector<8x128xf32> to vector<1x1x8x128xf32>
    tpu.vector_store %arg6[%c0_112, %c2_113, %c0_114, %c0_115], %184 {strides = array<i32>} : memref<1x6x8x128xf32, #tpu.memory_space<vmem>>, vector<1x1x8x128xf32>,
    %c0_116 = arith.constant 0 : index
    %c3_117 = arith.constant 3 : index
    %c0_118 = arith.constant 0 : index
    %c0_119 = arith.constant 0 : index
    %185 = vector.load %arg6[%c0_116, %c3_117, %c0_118, %c0_119] : memref<1x6x8x128xf32, #tpu.memory_space<vmem>>, vector<1x1x8x128xf32>
    %186 = vector.shape_cast %185 : vector<1x1x8x128xf32> to vector<8x128xf32>
    %cst_120 = arith.constant 0.000000e+00 : f32
    %187 = vector.broadcast %cst_120 : f32 to vector<8x128xf32>
    %188 = arith.select %19, %160, %187 : vector<8x128xi1>, vector<8x128xf32>
    %189 = arith.addf %186, %188 : vector<8x128xf32>
    %c0_121 = arith.constant 0 : index
    %c3_122 = arith.constant 3 : index
    %c0_123 = arith.constant 0 : index
    %c0_124 = arith.constant 0 : index
    %190 = vector.load %arg6[%c0_121, %c3_122, %c0_123, %c0_124] : memref<1x6x8x128xf32, #tpu.memory_space<vmem>>, vector<1x1x8x128xf32>
    %191 = vector.shape_cast %190 : vector<1x1x8x128xf32> to vector<8x128xf32>
    %192 = vector.shape_cast %189 : vector<8x128xf32> to vector<1x1x8x128xf32>
    tpu.vector_store %arg6[%c0_121, %c3_122, %c0_123, %c0_124], %192 {strides = array<i32>} : memref<1x6x8x128xf32, #tpu.memory_space<vmem>>, vector<1x1x8x128xf32>,
    %c0_125 = arith.constant 0 : index
    %c4_126 = arith.constant 4 : index
    %c0_127 = arith.constant 0 : index
    %c0_128 = arith.constant 0 : index
    %193 = vector.load %arg6[%c0_125, %c4_126, %c0_127, %c0_128] : memref<1x6x8x128xf32, #tpu.memory_space<vmem>>, vector<1x1x8x128xf32>
    %194 = vector.shape_cast %193 : vector<1x1x8x128xf32> to vector<8x128xf32>
    %195 = arith.extui %19 : vector<8x128xi1> to vector<8x128xi32>
    %196 = arith.sitofp %195 : vector<8x128xi32> to vector<8x128xf32>
    %197 = arith.addf %194, %196 : vector<8x128xf32>
    %c0_129 = arith.constant 0 : index
    %c4_130 = arith.constant 4 : index
    %c0_131 = arith.constant 0 : index
    %c0_132 = arith.constant 0 : index
    %198 = vector.load %arg6[%c0_129, %c4_130, %c0_131, %c0_132] : memref<1x6x8x128xf32, #tpu.memory_space<vmem>>, vector<1x1x8x128xf32>
    %199 = vector.shape_cast %198 : vector<1x1x8x128xf32> to vector<8x128xf32>
    %200 = vector.shape_cast %197 : vector<8x128xf32> to vector<1x1x8x128xf32>
    tpu.vector_store %arg6[%c0_129, %c4_130, %c0_131, %c0_132], %200 {strides = array<i32>} : memref<1x6x8x128xf32, #tpu.memory_space<vmem>>, vector<1x1x8x128xf32>,
    %c0_133 = arith.constant 0 : index
    %c5_134 = arith.constant 5 : index
    %c0_135 = arith.constant 0 : index
    %c0_136 = arith.constant 0 : index
    %201 = vector.load %arg6[%c0_133, %c5_134, %c0_135, %c0_136] : memref<1x6x8x128xf32, #tpu.memory_space<vmem>>, vector<1x1x8x128xf32>
    %202 = vector.shape_cast %201 : vector<1x1x8x128xf32> to vector<8x128xf32>
    %203 = arith.extui %22 : vector<8x128xi1> to vector<8x128xi32>
    %204 = arith.sitofp %203 : vector<8x128xi32> to vector<8x128xf32>
    %205 = arith.addf %202, %204 : vector<8x128xf32>
    %c0_137 = arith.constant 0 : index
    %c5_138 = arith.constant 5 : index
    %c0_139 = arith.constant 0 : index
    %c0_140 = arith.constant 0 : index
    %206 = vector.load %arg6[%c0_137, %c5_138, %c0_139, %c0_140] : memref<1x6x8x128xf32, #tpu.memory_space<vmem>>, vector<1x1x8x128xf32>
    %207 = vector.shape_cast %206 : vector<1x1x8x128xf32> to vector<8x128xf32>
    %208 = vector.shape_cast %205 : vector<8x128xf32> to vector<1x1x8x128xf32>
    tpu.vector_store %arg6[%c0_137, %c5_138, %c0_139, %c0_140], %208 {strides = array<i32>} : memref<1x6x8x128xf32, #tpu.memory_space<vmem>>, vector<1x1x8x128xf32>,
    return
  }
  func.func @transform_0(%arg0: i32, %arg1: i32, %arg2: i32, %arg3: memref<3x2xf32, #tpu.memory_space<smem>>) -> (i32, i32, i32, i32) {
    %c1_i32 = arith.constant 1 : i32
    %0 = arith.muli %arg1, %c1_i32 : i32
    %1 = arith.addi %0, %arg2 : i32
    %c0_i32 = arith.constant 0 : i32
    %c0_i32_0 = arith.constant 0 : i32
    %c0_i32_1 = arith.constant 0 : i32
    return %arg0, %c0_i32, %1, %c0_i32_0 : i32, i32, i32, i32
  }
  func.func @transform_1(%arg0: i32, %arg1: i32, %arg2: i32, %arg3: memref<3x2xf32, #tpu.memory_space<smem>>) -> (i32, i32, i32, i32) {
    %c1_i32 = arith.constant 1 : i32
    %0 = arith.muli %arg1, %c1_i32 : i32
    %1 = arith.addi %0, %arg2 : i32
    %c0_i32 = arith.constant 0 : i32
    %c0_i32_0 = arith.constant 0 : i32
    %c0_i32_1 = arith.constant 0 : i32
    return %arg0, %c0_i32, %1, %c0_i32_0 : i32, i32, i32, i32
  }
  func.func @transform_2(%arg0: i32, %arg1: i32, %arg2: i32, %arg3: memref<3x2xf32, #tpu.memory_space<smem>>) -> (i32, i32, i32, i32) {
    %c1_i32 = arith.constant 1 : i32
    %0 = arith.muli %arg0, %c1_i32 : i32
    %1 = arith.addi %0, %arg1 : i32
    %c0_i32 = arith.constant 0 : i32
    %c0_i32_0 = arith.constant 0 : i32
    %c0_i32_1 = arith.constant 0 : i32
    %c0_i32_2 = arith.constant 0 : i32
    return %1, %c0_i32, %c0_i32_0, %c0_i32_1 : i32, i32, i32, i32
  }
}

</mosaic_0001>

<bundles_post_ra>
// kernel: yolo_loss.1
= control target key start
LH: loop header
LB: loop body
LE: loop exit
PB: predicated region body
PF: predicated region fallthrough
CT: control target
= control target key end

     0   :  { %s672_s15 = smov [#allocation3]   ;;  %s894_s0 = inlined_call_operand.vmem [shape: f32[3,2], index: 0, kind: input, shape index: {}]   ;;  %s895_s1 = inlined_call_operand.vmem [shape: bf16[3,9,8,128], index: 1, kind: input, shape index: {}]   ;;  %s896_s2 = inlined_call_operand.vmem [shape: f32[3,6,8,128], index: 2, kind: input, shape index: {}]   ;;  %s897_s3 = inlined_call_operand.vmem [shape: f32[3,6,8,128], index: 3, kind: output, shape index: {}]  }
   0x1   :  { %s9_s14 = sshll.u32 %s894_s0, 4  ;;  %s10_s14 = int_to_ptr.vmem [resolvable:$true] %s9_s14 }
   0x2   :  { %12 = dma.vmem_to_smem %s10_s14, 64, %s672_s15, [#allocation2] }
   0x3   :  { %658 = dma.done.wait [#allocation2], 64 }
   0x4   :  { %659 = vsyncadd [#allocation2], 4294967232 }
   0x5   :  { %15 = sfence }
   0x6   :  { %s697_s16 = smov 0   ;;  %s699_s17 = smov 0  }
   0x7   :  { %s701_s18 = smov 0  }
   0x8 LB: > { %s40_s0 = sadd.s32 1, %s666_s17  ;;  %p541_p0 = scmp.ge.s32.totalorder %s670_s18, 1  ;;  %s670_s18 = sphi %s701_s18, %s21_s18   ;;  %s666_s17 = sphi %s699_s17, %s911_s17   ;;  %s662_s16 = sphi %s697_s16, %s910_s16  }
   0x9   : > { %p42_p1 = scmp.ge.s32.totalorder %s40_s0, 3  ;;  %p170_p2 = scmp.lt.s32.totalorder %s670_s18, 4 }
   0xb   : > { %s913_s0 = smov (%p42_p1, %s40_s0), 0  ;;  %p171_p3 = pnand %p541_p0, %p170_p2 }
   0xc   : > { %p207_p4 = scmp.lt.s32.totalorder (!%p171_p3), %s662_s16, 2  ;;  %s545_s19 = sshll.u32 (!%p171_p3), %s662_s16, 7 }
   0xd   : > { %174 = sbr.rel (%p171_p3) target bundleno = 71 (0x47), region = 28  ;;  %s715_s20 = sld [smem:[#allocation3 + %s545_s19]] (!%p171_p3) }
   0xe   : > { %s261_s21 = sadd.s32 (!%p171_p3), 1, %s545_s19 }
   0xf   : > { %s719_s22 = sld [smem:[#allocation3 + %s261_s21]] (!%p171_p3) }
  0x12   : > { %v245_v0 = vlaneseq  ;;  %s915_s16 = smov (!%p207_p4, %s662_s16), 2 }
  0x13   : > { %s581_s23 = smul.u32 48, %s915_s16  ;;  %v334_v13 = vstv %s715_s20 }
  0x14   : > { %v246_v1 = vshrl.u32 %v245_v0, 7  ;;  %v248_v2 = vand.u32 127, %v245_v0  ;;  %s580_s24 = smul.u32 36, %s915_s16 }
  0x15   : > { %s728_s27 = scalar_lea.vmem %s896_s2, %s581_s23  ;;  %v339_v19 = vstv %s719_s22  ;;  %s817_s6 = scalar_lea.vmem %s897_s3, %s581_s23 }
  0x16   : > { %v251_v3 = vmul.u32 128, %v246_v1  ;;  %s214_s30 = scalar_lea.vmem %s895_s1, %s580_s24  ;;  %v736_v5 = vld [vmem:[%s728_s27] sm:$0xff]  ;;  %v552_v12 = vld [vmem:[%s728_s27 + $0x18] sm:$0xff] }
  0x17   : > { %v263_v6 = vld [vmem:[%s214_s30] sm:$0xff]   ;;  %v738_v7 = vld [vmem:[%s214_s30 + $0x8] sm:$0xff]   ;;  %v741_v11 = vld [vmem:[%s214_s30 + $0x10] sm:$0xff]   ;;  %vm255_vm1 = vcmp.eq.f32.partialorder %v736_v5, 1.0  ;;  %v335_v24 = vmul.f32 %v552_v12, %v334_v13  ;;  %vm257_vm3 = vcmp.eq.f32.partialorder %v736_v5, 0.0  ;;  %v673_v12 = vmov 0.0  }
  0x18   : > { %v730_v4 = vadd.s32 %v251_v3, %v248_v2  ;;  %v264_v8 = vunpack.c.l.bf16 %v263_v6  ;;  %v284_v9 = vunpack.c.h.bf16 %v263_v6  ;;  %v309_v10 = vunpack.c.l.bf16 %v738_v7  ;;  %v579_v15 = vld [vmem:[%s214_s30 + $0x18] sm:$0xff]   ;;  %v553_v18 = vld [vmem:[%s728_s27 + $0x20] sm:$0xff] }
  0x19   : > { %v747_v14 = vunpack.c.h.bf16 %v741_v11  ;;  %v752_v21 = vunpack.c.l.bf16 %v579_v15  ;;  %v560_v22 = vld [vmem:[%s214_s30 + $0x20] sm:$0xf]  ;;  %v340_v26 = vmul.f32 %v553_v18, %v339_v19  ;;  %v760_v27 = vunpack.c.h.bf16 %v579_v15 }
  0x1a   : > { %vm253_vm0 = vcmp.lt.s32.totalorder %v730_v4, 512  ;;  %v268_v16 = vand.u32 2147483647, %v264_v8  ;;  %v547_v17 = vmul.f32 -1.442695, %v284_v9  ;;  %v764_v30 = vunpack.c.l.bf16 %v560_v22 }
  0x1b   : > { %v550_v20 = vmul.f32 -1.442695, %v309_v10  ;;  %vm756_vm2 = vmand %vm255_vm1, %vm253_vm0  ;;  %v371_v28 = vmax.f32 %v747_v14, %v752_v21  ;;  %v265_v41 = vmax.f32 %v264_v8, 0.0  ;;  %v266_v42 = vmul.f32 %v264_v8, %v736_v5  ;;  %v820_v10 = vld [vmem:[%s728_s27 + $0x28] sm:$0xff] }
  0x1c   : > { %v269_v23 = vsub.f32 0.0, %v268_v16  ;;  %608 = vpow2.f32 %v547_v17  ;;  %v336_v32 = vsel %vm756_vm2, %v335_v24, 1.0  ;;  %v341_v33 = vsel %vm756_vm2, %v340_v26, 1.0  ;;  %vm798_vm5 = vmand %vm257_vm3, %vm253_vm0 }
  0x1d   : > { %610 = vpow2.f32 %v550_v20  ;;  %v375_v31 = vmax.f32 %v371_v28, %v760_v27  ;;  %v345_v38 = vadd.f32 1e-16, %v336_v32  ;;  %v352_v40 = vadd.f32 1e-16, %v341_v33 }
  0x1e   : > { %v270_v29 = vmul.f32 1.442695, %v269_v23  ;;  %v344_v49 = vunpack.c.h.bf16 %v738_v7  ;;  %v351_v51 = vunpack.c.l.bf16 %v741_v11  ;;  %v267_v53 = vsub.f32 %v265_v41, %v266_v42 }
  0x1f   : > { %v772_v35 = vmax.f32 %v375_v31, %v764_v30  ;;  %v568_v13 = vsel %vm756_vm2, 1.0, %v673_v12  ;;  %v571_v15 = vsel %vm798_vm5, 1.0, %v673_v12  ;;  %vm384_vm11 = vcmp.eq.f32.partialorder %v820_v10, 0.0 }
  0x20   : > { %612 = vpow2.f32 %v270_v29  ;;  %vm391_vm12 = vcmp.eq.f32.partialorder %v820_v10, 1.0  ;;  %569 = vst [vmem:[%s817_s6 + $0x20] sm:$0xff] %v568_v13  ;;  %vm398_vm0 = vcmp.eq.f32.partialorder %v820_v10, 2.0  ;;  %vm405_vm1 = vcmp.eq.f32.partialorder %v820_v10, 3.0 }
  0x21   : > { %v380_v44 = vsub.f32 %v747_v14, %v772_v35  ;;  %v387_v45 = vsub.f32 %v752_v21, %v772_v35  ;;  %v394_v46 = vsub.f32 %v760_v27, %v772_v35  ;;  %v401_v52 = vsub.f32 %v764_v30, %v772_v35  ;;  %572 = vst [vmem:[%s817_s6 + $0x28] sm:$0xff] %v571_v15 }
  0x22   : > { %v609_v34 = vpop.eup %608  ;;  %v399_v11 = vsel %vm398_vm0, %v760_v27, 0.0 }
  0x23   : > { %v611_v36 = vpop.eup %610  ;;  %v774_v37 = vadd.f32 1.0, %v609_v34  ;;  %v381_v56 = vmul.f32 1.442695, %v380_v44  ;;  %v388_v57 = vmul.f32 1.442695, %v387_v45  ;;  %v385_v44 = vsel %vm384_vm11, %v747_v14, 0.0 }
  0x24   : > { %v776_v39 = vadd.f32 1.0, %v611_v36  ;;  %v395_v58 = vmul.f32 1.442695, %v394_v46  ;;  %v402_v3 = vmul.f32 1.442695, %v401_v52 }
  0x25   : > { %614 = vrcp.f32 %v774_v37  ;;  %v298_v55 = vand.u32 2147483647, %v774_v37  ;;  %vm294_vm4 = vweird.f32 %v774_v37  ;;  %v300_v61 = vand.u32 2147483648, %v774_v37 }
  0x26   : > { %v613_v43 = vpop.eup %612  ;;  %616 = vrcp.f32 %v776_v39  ;;  %vm319_vm6 = vweird.f32 %v776_v39  ;;  %v323_v62 = vand.u32 2147483647, %v776_v39  ;;  %v325_v63 = vand.u32 2147483648, %v776_v39 }
  0x27   : > { %v272_v47 = vadd.f32 1.0, %v613_v43  ;;  %v275_v48 = vmul.f32 -0.5, %v613_v43  ;;  %618 = vlog2.f32 %v345_v38  ;;  %v278_v50 = vand.u32 2147483647, %v613_v43 }
  0x28   : > { %620 = vlog2.f32 %v352_v40  ;;  %v301_v23 = vor.u32 1.1754944e-38, %v300_v61  ;;  %vm838_vm13 = vcmp.eq.f32.partialorder %v298_v55, 8.507059e+37  ;;  %v326_v33 = vor.u32 1.1754944e-38, %v325_v63 }
  0x29   : > { %622 = vlog2.f32 %v272_v47  ;;  %v276_v54 = vadd.f32 1.0, %v275_v48  ;;  %vm806_vm7 = vcmp.lt.f32.partialorder %v278_v50, 0.0004427343  ;;  %vm324_vm15 = vcmp.eq.f32.partialorder %v323_v62, 8.507059e+37 }
  0x2a   : > { %624 = vpow2.f32 %v381_v56 }
  0x2b   : > { %v615_v59 = vpop.eup %614  ;;  %v277_v5 = vmul.f32 %v613_v43, %v276_v54  ;;  %626 = vpow2.f32 %v388_v57  ;;  %v551_v43 = vld [vmem:[%s728_s27 + $0x10] sm:$0xff]  ;;  %v392_v54 = vsel %vm391_vm12, %v752_v21, 0.0 }
  0x2c   : > { %v617_v0 = vpop.eup %616  ;;  %v290_v2 = vmul.f32 %v615_v59, %v774_v37  ;;  %vm295_vm8 = vweird.f32 %v615_v59  ;;  %628 = vpow2.f32 %v395_v58  ;;  %v548_v37 = vld [vmem:[%s728_s27 + $0x8] sm:$0xff]  ;;  %v393_v60 = vadd.f32 %v392_v54, %v385_v44 }
  0x2d   : > { %v619_v4 = vpop.eup %618  ;;  %v315_v6 = vmul.f32 %v617_v0, %v776_v39  ;;  %vm320_vm9 = vweird.f32 %v617_v0  ;;  %630 = vpow2.f32 %v402_v3  ;;  %vm829_vm10 = vmor %vm294_vm4, %vm295_vm8 }
  0x2e   : > { %v621_v8 = vpop.eup %620  ;;  %v291_v9 = vsub.f32 1.0, %v290_v2  ;;  %v347_v20 = vmul.f32 0.6931472, %v619_v4  ;;  %vm845_vm14 = vmor %vm319_vm6, %vm320_vm9 }
  0x2f   : > { %v623_v16 = vpop.eup %622  ;;  %v316_v17 = vsub.f32 1.0, %v315_v6  ;;  %v354_v40 = vmul.f32 0.6931472, %v621_v8 }
  0x30   : > { %v274_v18 = vmul.f32 0.6931472, %v623_v16  ;;  %v292_v19 = vmul.f32 %v615_v59, %v291_v9  ;;  %v625_v26 = vpop.eup %624  ;;  %v348_v39 = vsub.f32 %v344_v49, %v347_v20 }
  0x31   : > { %v317_v24 = vmul.f32 %v617_v0, %v316_v17  ;;  %v627_v34 = vpop.eup %626  ;;  %v355_v14 = vsub.f32 %v351_v51, %v354_v40  ;;  %v400_v51 = vadd.f32 %v399_v11, %v393_v60 }
  0x32   : > { %v280_v28 = vsel %vm806_vm7, %v277_v5, %v274_v18  ;;  %v293_v29 = vadd.f32 %v615_v59, %v292_v19  ;;  %v629_v41 = vpop.eup %628  ;;  %v390_v45 = vadd.f32 %v627_v34, %v625_v26  ;;  %v359_v58 = vmul.f32 %v348_v39, %v348_v39 }
  0x33   : > { %v281_v36 = vadd.f32 %v280_v28, %v267_v53  ;;  %v318_v38 = vadd.f32 %v617_v0, %v317_v24  ;;  %v631_v7 = vpop.eup %630  ;;  %v361_v62 = vmul.f32 %v355_v14, %v355_v14 }
  0x34   : > { %v297_v42 = vsel %vm829_vm10, %v615_v59, %v293_v29  ;;  %v397_v55 = vadd.f32 %v629_v41, %v390_v45 }
  0x35   : > { %v413_v46 = vsel %vm798_vm5, %v281_v36, 0.0  ;;  %v418_v47 = vsel %vm756_vm2, %v281_v36, 0.0  ;;  %v302_v48 = vsel %vm838_vm13, %v301_v23, %v297_v42  ;;  %v322_v50 = vsel %vm845_vm14, %v617_v0, %v318_v38 }
  0x36   : > { %v306_v49 = vsub.f32 %v302_v48, %v548_v37  ;;  %v327_v52 = vsel %vm324_vm15, %v326_v33, %v322_v50  ;;  %415 = vst [vmem:[%s817_s6] sm:$0xff] %v413_v46  ;;  %v404_v59 = vadd.f32 %v631_v7, %v397_v55  ;;  %v406_v0 = vsel %vm405_vm1, %v764_v30, 0.0 }
  0x37   : > { %v331_v53 = vsub.f32 %v327_v52, %v551_v43  ;;  %562 = vst [vmem:[%s817_s6 + $0x8] sm:$0xff] %v418_v47  ;;  %v407_v3 = vadd.f32 %v406_v0, %v400_v51 }
  0x38   : > { %v356_v56 = vmul.f32 %v306_v49, %v306_v49  ;;  %632 = vlog2.f32 %v404_v59 }
  0x39   : > { %v357_v57 = vmul.f32 %v331_v53, %v331_v53 }
  0x3b   : > { %v358_v61 = vadd.f32 %v357_v57, %v356_v56 }
  0x3d   : > { %v360_v21 = vadd.f32 %v359_v58, %v358_v61 }
  0x3e   : > { %v633_v1 = vpop.eup %632 }
  0x3f   : > { %v362_v63 = vadd.f32 %v361_v62, %v360_v21  ;;  %v409_v4 = vmul.f32 0.6931472, %v633_v1 }
  0x41   : > { %v423_v2 = vsel %vm756_vm2, %v362_v63, 0.0  ;;  %v410_v5 = vadd.f32 %v409_v4, %v772_v35 }
  0x42   : > { %564 = vst [vmem:[%s817_s6 + $0x10] sm:$0xff] %v423_v2 }
  0x43   : > { %v411_v6 = vsub.f32 %v410_v5, %v407_v3 }
  0x45   : > { %v428_v27 = vsel %vm756_vm2, %v411_v6, 0.0 }
  0x46   : > { %566 = vst [vmem:[%s817_s6 + $0x18] sm:$0xff] %v428_v27 }
  0x47 PF: > { %s21_s18 = sadd.s32 1, %s670_s18   ;;  %s910_s16 = smov %s666_s17 }
  0x48   : > { %p18_p5 = scmp.ge.s32.totalorder %s21_s18, 5   ;;  %s911_s17 = smov %s913_s0 }
  0x4a   :  { %20 = sbr.rel (!%p18_p5) target bundleno = 8 (0x8), region = 83 }

</bundles_post_ra>
